<compile_context>
chip_gen: v7x
topology: tpu7x:2x2x1
jax: 0.10.0
libtpu: 0.0.40
codegen_flags: <defaults>
</compile_context>

<pallas_src>
import jax
import jax.numpy as jnp
from jax import lax
from jax.experimental import pallas as pl
from jax.experimental.pallas import tpu as pltpu

BN_EPS = 0.001


def linear_block_kernel(x_ref, w_ref, p_ref, o_ref):
    """One grid step handles a full N-tile: y = x @ W + b, batch-norm, ReLU.

    x_ref: (B, K)   resident across the N grid
    w_ref: (K, tn)  N-tile of the (transposed) weight
    p_ref: (3, tn)  packed [bias; gamma; beta]
    o_ref: (B, tn)
    """
    y = jnp.dot(x_ref[...], w_ref[...], preferred_element_type=jnp.float32)
    y = y + p_ref[0:1, :]                                   # bias (cancelled by BN, kept for exact semantics)

    # BatchNorm1d with track_running_stats=False always uses batch statistics
    # (biased variance), eps=1e-3, affine=True.
    mean = jnp.mean(y, axis=0, keepdims=True)               # (1, tn)
    var = jnp.mean((y - mean) * (y - mean), axis=0, keepdims=True)
    y_hat = (y - mean) * lax.rsqrt(var + BN_EPS)
    z = y_hat * p_ref[1:2, :] + p_ref[2:3, :]               # gamma, beta
    o_ref[...] = jnp.maximum(z, 0.0).astype(o_ref.dtype)    # ReLU


def linear_block(x, w_t, bias, gamma, beta, *, tn=None):
    """x: (B, K) f32, w_t: (K, N) f32 (already transposed), bias/gamma/beta: (N,)."""
    B, K = x.shape
    Kw, N = w_t.shape
    assert Kw == K

    if tn is None:
        tn = N if N <= 128 else 128
    assert N % tn == 0, "N must be divisible by the N tile"

    # Pack the three per-feature vectors into one resident (3, N) block.
    params = jnp.stack(
        [bias.astype(jnp.float32), gamma.astype(jnp.float32), beta.astype(jnp.float32)],
        axis=0,
    )

    return pl.pallas_call(
        linear_block_kernel,
        out_shape=jax.ShapeDtypeStruct((B, N), x.dtype),
        grid_spec=pltpu.PrefetchScalarGridSpec(
            num_scalar_prefetch=0,
            grid=(N // tn,),
            in_specs=[
                pl.BlockSpec((B, K), lambda n: (0, 0)),    # x: whole batch, resident
                pl.BlockSpec((K, tn), lambda n: (0, n)),   # W: N-tile
                pl.BlockSpec((3, tn), lambda n: (0, n)),   # packed bias/gamma/beta
            ],
            out_specs=pl.BlockSpec((B, tn), lambda n: (0, n)),
        ),
        compiler_params=pltpu.CompilerParams(
            dimension_semantics=("parallel",),  # N tiles are independent (BN stats are per-feature)
        ),
    )(x, w_t, params)


def reference(x, w_t, bias, gamma, beta):
    y = x @ w_t + bias
    mean = jnp.mean(y, axis=0, keepdims=True)
    var = jnp.mean((y - mean) ** 2, axis=0, keepdims=True)
    z = (y - mean) / jnp.sqrt(var + BN_EPS) * gamma + beta
    return jnp.maximum(z, 0.0)


if __name__ == "__main__":
    batch, input_size, output_size = 8, 256, 128
    key = jax.random.PRNGKey(0)
    kx, kw = jax.random.split(key)

    # Deterministic parameter init mirroring fc_init_:
    #   weight ~ truncated_normal(-2, 2) * 0.01, bias = 0
    #   BatchNorm affine params: gamma = 1, beta = 0
    w = 0.01 * jax.random.truncated_normal(
        kw, -2.0, 2.0, (output_size, input_size), dtype=jnp.float32
    )
    w_t = w.T  # (input_size, output_size) so the kernel computes x @ W
    bias = jnp.zeros((output_size,), jnp.float32)
    gamma = jnp.ones((output_size,), jnp.float32)
    beta = jnp.zeros((output_size,), jnp.float32)

    x = jax.random.normal(kx, (batch, input_size), dtype=jnp.float32)

    out = linear_block(x, w_t, bias, gamma, beta)
    out = jax.block_until_ready(out)

    ref = reference(x, w_t, bias, gamma, beta)
    assert out.shape == (batch, output_size)
    assert jnp.allclose(out, ref, atol=1e-4, rtol=1e-4), "mismatch vs reference"
    print("KERNEL_OK")
</pallas_src>

<mosaic_0001>
module attributes {stable_mosaic.version = 11 : i64} {
  func.func @linear_block_kernel(%arg0: i32, %arg1: memref<8x256xf32, #tpu.memory_space<vmem>>, %arg2: memref<256x128xf32, #tpu.memory_space<vmem>>, %arg3: memref<3x128xf32, #tpu.memory_space<vmem>>, %arg4: memref<8x128xf32, #tpu.memory_space<vmem>>) attributes {dimension_semantics = [#tpu.dimension_semantics<parallel>], iteration_bounds = array<i64: 1>, scalar_prefetch = 0 : i64, scratch_operands = 0 : i64, tpu.core_type = #tpu.core_type<tc>, window_params = [{pipeline_mode = #tpu.pipeline_mode<synchronous>, transform_indices = @transform_0, window_bounds = array<i64: 8, 256>}, {transform_indices = @transform_1, window_bounds = array<i64: 256, 128>}, {transform_indices = @transform_2, window_bounds = array<i64: 3, 128>}, {transform_indices = @transform_3, window_bounds = array<i64: 8, 128>}]} {
    %c0 = arith.constant 0 : index
    %c0_0 = arith.constant 0 : index
    %0 = vector.load %arg1[%c0, %c0_0] : memref<8x256xf32, #tpu.memory_space<vmem>>, vector<8x256xf32>
    %c0_1 = arith.constant 0 : index
    %c0_2 = arith.constant 0 : index
    %1 = vector.load %arg2[%c0_1, %c0_2] : memref<256x128xf32, #tpu.memory_space<vmem>>, vector<256x128xf32>
    %cst = arith.constant dense<0.000000e+00> : vector<8x128xf32>
    %2 = tpu.matmul %0, %1, %cst {dimension_numbers = #tpu.dot_dimension_numbers<[1], [0], [0], [1], [0, 0, 1, 1], [], []>} : vector<8x256xf32>, vector<256x128xf32>, vector<8x128xf32> -> vector<8x128xf32>
    %c0_3 = arith.constant 0 : index
    %c0_4 = arith.constant 0 : index
    %3 = vector.load %arg3[%c0_3, %c0_4] : memref<3x128xf32, #tpu.memory_space<vmem>>, vector<1x128xf32>
    %4 = vector.broadcast %3 : vector<1x128xf32> to vector<8x128xf32>
    %5 = arith.addf %2, %4 : vector<8x128xf32>
    %cst_5 = arith.constant dense<0.000000e+00> : vector<128xf32>
    %6 = vector.multi_reduction <add>, %5, %cst_5 [0] : vector<8x128xf32> to vector<128xf32>
    %7 = vector.shape_cast %6 : vector<128xf32> to vector<1x128xf32>
    %cst_6 = arith.constant 8.000000e+00 : f32
    %8 = vector.broadcast %cst_6 : f32 to vector<1x128xf32>
    %9 = arith.divf %7, %8 : vector<1x128xf32>
    %10 = vector.broadcast %9 : vector<1x128xf32> to vector<8x128xf32>
    %11 = arith.subf %5, %10 : vector<8x128xf32>
    %12 = vector.broadcast %9 : vector<1x128xf32> to vector<8x128xf32>
    %13 = arith.subf %5, %12 : vector<8x128xf32>
    %14 = arith.mulf %11, %13 : vector<8x128xf32>
    %cst_7 = arith.constant dense<0.000000e+00> : vector<128xf32>
    %15 = vector.multi_reduction <add>, %14, %cst_7 [0] : vector<8x128xf32> to vector<128xf32>
    %16 = vector.shape_cast %15 : vector<128xf32> to vector<1x128xf32>
    %cst_8 = arith.constant 8.000000e+00 : f32
    %17 = vector.broadcast %cst_8 : f32 to vector<1x128xf32>
    %18 = arith.divf %16, %17 : vector<1x128xf32>
    %19 = vector.broadcast %9 : vector<1x128xf32> to vector<8x128xf32>
    %20 = arith.subf %5, %19 : vector<8x128xf32>
    %cst_9 = arith.constant 1.000000e-03 : f32
    %21 = vector.broadcast %cst_9 : f32 to vector<1x128xf32>
    %22 = arith.addf %18, %21 : vector<1x128xf32>
    %23 = math.rsqrt %22 : vector<1x128xf32>
    %24 = vector.broadcast %23 : vector<1x128xf32> to vector<8x128xf32>
    %25 = arith.mulf %20, %24 : vector<8x128xf32>
    %c1 = arith.constant 1 : index
    %c0_10 = arith.constant 0 : index
    %26 = vector.load %arg3[%c1, %c0_10] : memref<3x128xf32, #tpu.memory_space<vmem>>, vector<1x128xf32>
    %27 = vector.broadcast %26 : vector<1x128xf32> to vector<8x128xf32>
    %28 = arith.mulf %25, %27 : vector<8x128xf32>
    %c2 = arith.constant 2 : index
    %c0_11 = arith.constant 0 : index
    %29 = vector.load %arg3[%c2, %c0_11] : memref<3x128xf32, #tpu.memory_space<vmem>>, vector<1x128xf32>
    %30 = vector.broadcast %29 : vector<1x128xf32> to vector<8x128xf32>
    %31 = arith.addf %28, %30 : vector<8x128xf32>
    %cst_12 = arith.constant 0.000000e+00 : f32
    %32 = vector.broadcast %cst_12 : f32 to vector<8x128xf32>
    %33 = arith.maximumf %31, %32 : vector<8x128xf32>
    %c0_13 = arith.constant 0 : index
    %c0_14 = arith.constant 0 : index
    %34 = vector.load %arg4[%c0_13, %c0_14] : memref<8x128xf32, #tpu.memory_space<vmem>>, vector<8x128xf32>
    tpu.vector_store %arg4[%c0_13, %c0_14], %33 {strides = array<i32>} : memref<8x128xf32, #tpu.memory_space<vmem>>, vector<8x128xf32>,
    return
  }
  func.func @transform_0(%arg0: i32) -> (i32, i32) {
    %c0_i32 = arith.constant 0 : i32
    %c0_i32_0 = arith.constant 0 : i32
    %c0_i32_1 = arith.constant 0 : i32
    return %c0_i32, %c0_i32_0 : i32, i32
  }
  func.func @transform_1(%arg0: i32) -> (i32, i32) {
    %c0_i32 = arith.constant 0 : i32
    %c0_i32_0 = arith.constant 0 : i32
    return %c0_i32, %arg0 : i32, i32
  }
  func.func @transform_2(%arg0: i32) -> (i32, i32) {
    %c0_i32 = arith.constant 0 : i32
    %c0_i32_0 = arith.constant 0 : i32
    return %c0_i32, %arg0 : i32, i32
  }
  func.func @transform_3(%arg0: i32) -> (i32, i32) {
    %c0_i32 = arith.constant 0 : i32
    %c0_i32_0 = arith.constant 0 : i32
    return %c0_i32, %arg0 : i32, i32
  }
}

</mosaic_0001>

<bundles_post_ra>
// kernel: tpu_custom_call.1
= control target key start
LH: loop header
LB: loop body
LE: loop exit
PB: predicated region body
PF: predicated region fallthrough
CT: control target
= control target key end

     0   :  { %8 = vsyncpa [#allocation3], 0  ;;  %s426_s0 = inlined_call_operand.hbm [shape: f32[8,256], index: 0, kind: input, shape index: {}]   ;;  %s427_s1 = inlined_call_operand.hbm [shape: f32[256,128], index: 1, kind: input, shape index: {}]   ;;  %s428_s2 = inlined_call_operand.vmem [shape: f32[3,128], index: 2, kind: input, shape index: {}]   ;;  %s429_s3 = inlined_call_operand.hbm [shape: f32[8,128], index: 3, kind: output, shape index: {}]  }
   0x1   :  { %9 = vsyncpa [#allocation6], 0 }
   0x2   :  { %10 = vsyncpa [#allocation4], 0  ;;  %s349_s12 = smov [#allocation2]   ;;  %s350_s14 = smov [#allocation5]  }
   0x3   :  { %s17_s13 = sshll.u32 %s349_s12, 4  ;;  %s26_s15 = sshll.u32 %s350_s14, 4  ;;  %s18_s13 = int_to_ptr.vmem [resolvable:$true] %s17_s13  ;;  %s374_s15 = int_to_ptr.vmem [resolvable:$true] %s26_s15 }
   0x4   :  { %s277_s18 = scalar_lea.hbm %s426_s0, 256 }
   0x5   :  { %p278_p0 = scmp.ne.s32.totalorder %s426_s0, %s277_s18  ;;  %p281_p1 = scmp.lt.u32.totalorder %s277_s18, %s426_s0 }
   0x7   :  { %p283_p2 = pnand %p281_p1, %p278_p0 }
   0x9   :  { %286 = shalt.err (!%p283_p2)
}
   0xa   :  { %s287_s23 = scalar_lea.vmem %s18_s13, 256  ;;  %p292_p4 = scmp.lt.s32.totalorder %s18_s13, %s18_s13 }
   0xb   :  { %p288_p3 = scmp.ne.s32.totalorder %s18_s13, %s287_s23  ;;  %p293_p5 = scmp.lt.s32.totalorder %s287_s23, %s287_s23 }
   0xd   :  { %p294_p6 = por %p293_p5, %p292_p4 }
   0xf   :  { %p295_p7 = pnand %p294_p6, %p288_p3 }
  0x11   :  { %298 = shalt.err (!%p295_p7)
}
  0x12   :  { %20 = dma.hbm_to_vmem [thread:$0]  %s426_s0, 256, %s18_s13, [#allocation3]  }
  0x13   :  { %s299_s28 = scalar_lea.hbm %s427_s1, 4096 }
  0x14   :  { %p300_p8 = scmp.ne.s32.totalorder %s427_s1, %s299_s28  ;;  %p303_p9 = scmp.lt.u32.totalorder %s299_s28, %s427_s1 }
  0x16   :  { %p305_p10 = pnand %p303_p9, %p300_p8 }
  0x18   :  { %308 = shalt.err (!%p305_p10)
}
  0x19   :  { %s309_s6 = scalar_lea.vmem %s374_s15, 4096  ;;  %p314_p12 = scmp.lt.s32.totalorder %s374_s15, %s374_s15 }
  0x1a   :  { %p310_p11 = scmp.ne.s32.totalorder %s374_s15, %s309_s6  ;;  %p315_p13 = scmp.lt.s32.totalorder %s309_s6, %s309_s6 }
  0x1c   :  { %p316_p0 = por %p315_p13, %p314_p12 }
  0x1e   :  { %p317_p1 = pnand %p316_p0, %p310_p11 }
  0x20   :  { %320 = shalt.err (!%p317_p1)
}
  0x21   :  { %s351_s0 = smov 128   ;;  %s352_s7 = smov 8  }
  0x22   :  { %32 = dma.hbm_to_vmem [thread:$0]  %s427_s1, 4096, %s374_s15, [#allocation6], %s351_s0, %s351_s0, %s352_s7  }
  0x23   :  { %343 = dma.done.wait [#allocation3], 256  }
  0x24   :  { %344 = vsyncadd [#allocation3], 4294967040 }
  0x25   :  { %345 = dma.done.wait [#allocation6], 4096  }
  0x26   :  { %346 = vsyncadd [#allocation6], 4294963200  ;;  %v59_v0 = vld [vmem:[#allocation5 + $0x80] sm:$0xff]  ;;  %v60_v1 = vld [vmem:[#allocation5 + $0x88] sm:$0xff]  ;;  %s353_s15 = smov [#allocation7]  }
  0x27   :  { %v43_v2 = vld [vmem:[#allocation5] sm:$0xff]  ;;  %v238_v3 = vpack.c.bf16 %v60_v1, %v59_v0  ;;  %v44_v4 = vld [vmem:[#allocation5 + $0x8] sm:$0xff]  ;;  %v61_v5 = vld [vmem:[#allocation5 + $0x90] sm:$0xff]  ;;  %s190_s16 = sshll.u32 %s353_s15, 4  ;;  %s191_s16 = int_to_ptr.vmem [resolvable:$true] %s190_s16 }
  0x28   :  { %v62_v6 = vld [vmem:[#allocation5 + $0x98] sm:$0xff]  ;;  %v240_v7 = vpack.c.bf16 %v44_v4, %v43_v2  ;;  %v45_v9 = vld [vmem:[#allocation5 + $0x10] sm:$0xff]  ;;  %v63_v11 = vld [vmem:[#allocation5 + $0xa0] sm:$0xff]  ;;  %s321_s17 = scalar_lea.vmem %s191_s16, 128  ;;  %p326_p3 = scmp.lt.s32.totalorder %s191_s16, %s191_s16 }
  0x29   :  { %v242_v8 = vpack.c.bf16 %v62_v6, %v61_v5  ;;  %v46_v10 = vld [vmem:[#allocation5 + $0x18] sm:$0xff]  ;;  %239 = vmatprep.subr.bf16.mxu0 %v238_v3  ;;  %v64_v12 = vld [vmem:[#allocation5 + $0xa8] sm:$0xff]  ;;  %v47_v15 = vld [vmem:[#allocation5 + $0x20] sm:$0xff]  ;;  %p322_p2 = scmp.ne.s32.totalorder %s191_s16, %s321_s17  ;;  %p327_p4 = scmp.lt.s32.totalorder %s321_s17, %s321_s17 }
  0x2a   :  { %241 = vmatpush3.bf16.msra.mxu0 %v240_v7  ;;  %v244_v13 = vpack.c.bf16 %v46_v10, %v45_v9  ;;  %v246_v14 = vpack.c.bf16 %v64_v12, %v63_v11  ;;  %v48_v16 = vld [vmem:[#allocation5 + $0x28] sm:$0xff]  ;;  %v65_v17 = vld [vmem:[#allocation5 + $0xb0] sm:$0xff]  ;;  %v66_v18 = vld [vmem:[#allocation5 + $0xb8] sm:$0xff] }
  0x2b   :  { %243 = vmatprep.subr.bf16.mxu0 %v242_v8  ;;  %v248_v19 = vpack.c.bf16 %v48_v16, %v47_v15  ;;  %v250_v20 = vpack.c.bf16 %v66_v18, %v65_v17  ;;  %v49_v21 = vld [vmem:[#allocation5 + $0x30] sm:$0xff]  ;;  %v50_v22 = vld [vmem:[#allocation5 + $0x38] sm:$0xff]  ;;  %v67_v23 = vld [vmem:[#allocation5 + $0xc0] sm:$0xff]  ;;  %p328_p5 = por %p327_p4, %p326_p3 }
  0x2c   :  { %v68_v24 = vld [vmem:[#allocation5 + $0xc8] sm:$0xff]  ;;  %v42_v25 = vld [vmem:[#allocation2 + $0x8] sm:$0xff]  ;;  %v252_v26 = vpack.c.bf16 %v50_v22, %v49_v21  ;;  %v51_v28 = vld [vmem:[#allocation5 + $0x40] sm:$0xff] }
  0x2d   :  { %144 = vmatprep.mubr.f32.mxu0 %v42_v25  ;;  %v254_v27 = vpack.c.bf16 %v68_v24, %v67_v23  ;;  %v52_v29 = vld [vmem:[#allocation5 + $0x48] sm:$0xff]  ;;  %v69_v30 = vld [vmem:[#allocation5 + $0xd0] sm:$0xff]  ;;  %v70_v31 = vld [vmem:[#allocation5 + $0xd8] sm:$0xff]  ;;  %p329_p6 = pnand %p328_p5, %p322_p2 }
  0x2e   :  { %245 = vmatpush3.bf16.msra.mxu0 %v244_v13  ;;  %v256_v32 = vpack.c.bf16 %v52_v29, %v51_v28  ;;  %v258_v33 = vpack.c.bf16 %v70_v31, %v69_v30  ;;  %v53_v34 = vld [vmem:[#allocation5 + $0x50] sm:$0xff]  ;;  %v54_v35 = vld [vmem:[#allocation5 + $0x58] sm:$0xff]  ;;  %v71_v36 = vld [vmem:[#allocation5 + $0xe0] sm:$0xff] }
  0x2f   :  { %247 = vmatprep.subr.bf16.mxu0 %v246_v14  ;;  %v72_v37 = vld [vmem:[#allocation5 + $0xe8] sm:$0xff]  ;;  %v260_v38 = vpack.c.bf16 %v54_v35, %v53_v34  ;;  %v55_v40 = vld [vmem:[#allocation5 + $0x60] sm:$0xff]  ;;  %v73_v42 = vld [vmem:[#allocation5 + $0xf0] sm:$0xff] }
  0x30   :  { %v262_v39 = vpack.c.bf16 %v72_v37, %v71_v36  ;;  %v56_v41 = vld [vmem:[#allocation5 + $0x68] sm:$0xff]  ;;  %v74_v43 = vld [vmem:[#allocation5 + $0xf8] sm:$0xff]  ;;  %v57_v46 = vld [vmem:[#allocation5 + $0x70] sm:$0xff] }
  0x31   :  { %v264_v44 = vpack.c.bf16 %v56_v41, %v55_v40  ;;  %v266_v45 = vpack.c.bf16 %v74_v43, %v73_v42  ;;  %v58_v47 = vld [vmem:[#allocation5 + $0x78] sm:$0xff]  ;;  %v41_v49 = vld [vmem:[#allocation2] sm:$0xff] }
  0x32   :  { %249 = vmatpush3.bf16.msra.mxu0 %v248_v19  ;;  %v268_v48 = vpack.c.bf16 %v58_v47, %v57_v46  ;;  %v200_v51 = vld [vmem:[%s428_s2] ss:$0 sm:$0xff]  ;;  %v201_v9 = vld [vmem:[%s428_s2 + $0x1] ss:$0 sm:$0xff]  ;;  %v202_v11 = vld [vmem:[%s428_s2 + $0x2] ss:$0 sm:$0xff] }
  0x33   :  { %251 = vmatprep.subr.bf16.mxu0 %v250_v20 }
  0x36   :  { %253 = vmatpush3.bf16.msra.mxu0 %v252_v26 }
  0x37   :  { %255 = vmatprep.subr.bf16.mxu0 %v254_v27 }
  0x3a   :  { %257 = vmatpush3.bf16.msra.mxu0 %v256_v32 }
  0x3b   :  { %259 = vmatprep.subr.bf16.mxu0 %v258_v33 }
  0x3e   :  { %261 = vmatpush3.bf16.msra.mxu0 %v260_v38 }
  0x3f   :  { %263 = vmatprep.subr.bf16.mxu0 %v262_v39 }
  0x42   :  { %265 = vmatpush3.bf16.msra.mxu0 %v264_v44 }
  0x43   :  { %267 = vmatprep.subr.bf16.mxu0 %v266_v45 }
  0x46   :  { %269 = vmatpush3.bf16.msra.mxu0 %v268_v48 }
  0x49   :  { %145 = vmatmul.mubr.f32.vlgmr.msra.gmra.mrb[0].mxu0 %v41_v49 }
 0x11c   :  { %v235_v50 = vpop.f32.mrb[0].mxu0 }
 0x11d   :  { %v236_v52 = vpop.f32.mrb[1].mxu0 }
 0x11e   :  { %v237_v53 = vadd.f32 %v236_v52, %v235_v50 }
 0x120   :  { %v147_v54 = vadd.f32 %v237_v53, %v200_v51 }
 0x122   :  { %v150_v55 = vrot.slane %v147_v54, 4 }
 0x124   :  { %v151_v56 = vadd.f32 %v150_v55, %v147_v54 }
 0x126   :  { %v152_v57 = vrot.slane %v151_v56, 2 }
 0x128   :  { %v153_v58 = vadd.f32 %v152_v57, %v151_v56 }
 0x12a   :  { %v154_v59 = vrot.slane %v153_v58, 1 }
 0x12c   :  { %v155_v60 = vadd.f32 %v154_v59, %v153_v58 }
 0x12e   :  { %v157_v61 = vmul.f32 0.125, %v155_v60 }
 0x130   :  { %v158_v62 = vsub.f32 %v147_v54, %v157_v61 }
 0x132   :  { %v159_v63 = vmul.f32 %v158_v62, %v158_v62 }
 0x134   :  { %v160_v0 = vrot.slane %v159_v63, 4 }
 0x136   :  { %v161_v1 = vadd.f32 %v160_v0, %v159_v63 }
 0x138   :  { %v162_v2 = vrot.slane %v161_v1, 2 }
 0x13a   :  { %v163_v3 = vadd.f32 %v162_v2, %v161_v1 }
 0x13c   :  { %v164_v4 = vrot.slane %v163_v3, 1 }
 0x13e   :  { %v165_v5 = vadd.f32 %v164_v4, %v163_v3 }
 0x140   :  { %v166_v6 = vmul.f32 0.125, %v165_v5 }
 0x142   :  { %v167_v7 = vadd.f32 0.001, %v166_v6 }
 0x144   :  { %275 = vrsqrt.f32 %v167_v7 }
 0x14e   :  { %v276_v8 = vpop.eup %275 }
 0x14f   :  { %v169_v10 = vmul.f32 %v276_v8, %v158_v62 }
 0x151   :  { %v175_v12 = vmul.f32 %v201_v9, %v169_v10 }
 0x153   :  { %v181_v13 = vadd.f32 %v202_v11, %v175_v12 }
 0x155   :  { %v182_v14 = vmax.f32 %v181_v13, 0.0 }
 0x157   :  { %183 = vst [vmem:[#allocation7] sm:$0xff] %v182_v14 }
 0x158   :  { %332 = shalt.err (!%p329_p6)
}
 0x159   :  { %s333_s20 = scalar_lea.hbm %s429_s3, 128 }
 0x15a   :  { %p334_p7 = scmp.ne.s32.totalorder %s429_s3, %s333_s20  ;;  %p337_p8 = scmp.lt.u32.totalorder %s333_s20, %s429_s3 }
 0x15c   :  { %p339_p9 = pnand %p337_p8, %p334_p7 }
 0x15e   :  { %342 = shalt.err (!%p339_p9)
}
 0x15f   :  { %193 = dma.vmem_to_hbm [thread:$0]  %s191_s16, 128, %s429_s3, [#allocation4]  }
 0x160   :  { %347 = dma.done.wait [#allocation4], 128  }
 0x161   :  { %348 = vsyncadd [#allocation4], 4294967168 }
 0x162   :  { %197 = vsyncpa [#allocation3], 1 }
 0x163   :  { %198 = vsyncpa [#allocation6], 1 }
 0x164   :  { %199 = vsyncpa [#allocation4], 1 }

</bundles_post_ra>
